<compile_context>
chip_gen: v7x
topology: tpu7x:2x2x1
jax: 0.10.0
libtpu: 0.0.40
codegen_flags: <defaults>
</compile_context>

<pallas_src>
import jax
import jax.numpy as jnp
from jax.experimental import pallas as pl
from jax.experimental.pallas import tpu as pltpu


def _round_up(x, m):
    return ((x + m - 1) // m) * m


def _global_avg_pool_kernel(x_ref, o_ref):
    # x_ref: (TB, HW, C) VMEM tile; o_ref: (TB, C) float32 pooled output.
    tb, hw, c = x_ref.shape
    inv_hw = jnp.float32(1.0 / hw)  # compile-time constant -> VPU multiply
    if x_ref.dtype == jnp.float32:
        # No cast temp needed: reduce directly over the sublane (HW) axis.
        o_ref[...] = jnp.sum(x_ref[...], axis=1) * inv_hw
    else:
        # Sub-32-bit input: accumulate in f32 over sublane-aligned HW chunks
        # so the upcast temp is bounded to one chunk, not 2x the whole tile.
        itemsize = jnp.dtype(x_ref.dtype).itemsize
        chunk = (8 * 4) // max(1, itemsize)  # one packed sublane group
        acc = jnp.zeros((tb, c), jnp.float32)
        for k0 in range(0, hw, chunk):  # static trip count (hw is static)
            k1 = min(k0 + chunk, hw)
            acc = acc + jnp.sum(x_ref[:, k0:k1, :].astype(jnp.float32), axis=1)
        o_ref[...] = acc * inv_hw


def _pick_batch_tile(B, HW, C, itemsize):
    """Pick the batch tile TB.

    Budget is per pipeline buffer (Pallas double-buffers inputs, so the real
    footprint is ~2x this plus the small output), sized to fit every
    generation's scoped-VMEM default (16 MiB v5e, 32 MiB v6e/v7x).  Per-batch
    cost includes HW sublane padding.  TB is a multiple of 8 (or equals B);
    the last block may be ragged -- Pallas masks the out-of-bounds output rows
    and the reduction is over HW, so padded batch rows only yield discarded
    values.
    """
    sublane_pack = 8 if itemsize >= 4 else (8 * 4) // max(1, itemsize)
    hw_pad = _round_up(HW, sublane_pack)
    per_batch = hw_pad * C * itemsize
    budget = 4 * 1024 * 1024  # bytes per pipeline buffer (x2 double buffering)
    max_tb = max(1, budget // max(1, per_batch))

    if B <= max_tb:
        if B < 16:
            # Tiny batch (e.g. the nominal B=2): one block, zero grid-step
            # overhead; splitting would only add ~0.35 us/step.
            return B
        # Fits one block, but split into >=2 so the ("parallel",) grid axis
        # can be sharded across the two v7x TensorCores; ~one extra grid step
        # elsewhere, which is cheap relative to the per-block DMA.
        return min(max_tb, max(8, _round_up(pl.cdiv(B, 2), 8)))

    # Tiled: largest multiple-of-8 tile under the budget; last block ragged.
    return max(8, (max_tb // 8) * 8)


def global_avg_pool_nhwc(x):
    """Global average pool over (H, W) of an NHWC tensor via Pallas.

    x: (B, H, W, C) any float dtype.
    returns: (B, C) float32 means.
    """
    B, H, W, C = x.shape
    HW = H * W
    xf = x.reshape(B, HW, C)  # contiguous, free reshape

    tb = _pick_batch_tile(B, HW, C, xf.dtype.itemsize)
    num_blocks = pl.cdiv(B, tb)

    out = pl.pallas_call(
        _global_avg_pool_kernel,
        out_shape=jax.ShapeDtypeStruct((B, C), jnp.float32),
        grid_spec=pltpu.PrefetchScalarGridSpec(
            num_scalar_prefetch=0,
            grid=(num_blocks,),
            in_specs=[pl.BlockSpec((tb, HW, C), lambda b: (b, 0, 0))],
            out_specs=pl.BlockSpec((tb, C), lambda b: (b, 0)),
        ),
        compiler_params=pltpu.CompilerParams(
            # Batch blocks are independent: shard across TensorCores on v7x;
            # harmless on single-TC v5e/v6e.
            dimension_semantics=("parallel",),
        ),
    )(xf)
    return out  # (B, C) float32


def main_branch_forward(feats):
    """Forward of MainBranch, starting from backbone features.

    feats: (B, H, W, C) channels-last features, i.e. the output of
           timm swin_tiny_patch4_window7_224 with head=Identity,
           or (B, 3, H, W) if the backbone were bypassed.
    returns: (B, C, 1, 1) float32, matching the PyTorch module output.
    """
    # TODO(synk): the timm swin_tiny_patch4_window7_224 backbone (self.model)
    # is a full transformer with no clean in-script Pallas equivalent; it is
    # treated as the producer of `feats` and is not re-implemented here.
    if feats.shape[1] != 3:
        # PyTorch path: permute(0,3,1,2) then AdaptiveAvgPool2d((1,1)).
        # Features are already channels-last, so pooling over (H, W) here is
        # exactly the permuted NCHW pool.
        pooled = global_avg_pool_nhwc(feats)                 # (B, C) f32
    else:
        # Already NCHW with 3 channels: pool over the trailing spatial axes.
        # (C=3 output lanes -> masked narrow store; cold path, data is tiny.)
        nhwc = jnp.transpose(feats, (0, 2, 3, 1))            # glue permute
        pooled = global_avg_pool_nhwc(nhwc)                  # (B, 3) f32
    B, C = pooled.shape
    return pooled.reshape(B, C, 1, 1)                        # metadata only


if __name__ == "__main__":
    # Swin-Tiny (224 input) final stage emits (B, 7, 7, 768) features.
    B, H, W, C = 2, 7, 7, 768
    key = jax.random.PRNGKey(0)
    feats = jax.random.normal(key, (B, H, W, C), dtype=jnp.float32)

    out = main_branch_forward(feats)
    out = jax.block_until_ready(out)

    # Reference check against plain JAX (permute + adaptive avg pool to 1x1).
    ref = jnp.mean(jnp.transpose(feats, (0, 3, 1, 2)), axis=(2, 3),
                   keepdims=True)
    assert out.shape == (B, C, 1, 1), out.shape
    assert out.dtype == jnp.float32, out.dtype
    assert jnp.allclose(out, ref, atol=1e-5, rtol=1e-5), "mismatch vs reference"

    print("KERNEL_OK")
</pallas_src>

<mosaic_0001>
module attributes {stable_mosaic.version = 11 : i64} {
  func.func @_global_avg_pool_kernel(%arg0: i32, %arg1: memref<2x49x768xf32, #tpu.memory_space<vmem>>, %arg2: memref<2x768xf32, #tpu.memory_space<vmem>>) attributes {dimension_semantics = [#tpu.dimension_semantics<parallel>], iteration_bounds = array<i64: 1>, scalar_prefetch = 0 : i64, scratch_operands = 0 : i64, tpu.core_type = #tpu.core_type<tc>, window_params = [{transform_indices = @transform_0, window_bounds = array<i64: 2, 49, 768>}, {transform_indices = @transform_1, window_bounds = array<i64: 2, 768>}]} {
    %c0 = arith.constant 0 : index
    %c0_0 = arith.constant 0 : index
    %c0_1 = arith.constant 0 : index
    %0 = vector.load %arg1[%c0, %c0_0, %c0_1] : memref<2x49x768xf32, #tpu.memory_space<vmem>>, vector<2x49x768xf32>
    %cst = arith.constant dense<0.000000e+00> : vector<2x768xf32>
    %1 = vector.multi_reduction <add>, %0, %cst [1] : vector<2x49x768xf32> to vector<2x768xf32>
    %cst_2 = arith.constant 0.0204081628 : f32
    %2 = vector.broadcast %cst_2 : f32 to vector<2x768xf32>
    %3 = arith.mulf %1, %2 : vector<2x768xf32>
    %c0_3 = arith.constant 0 : index
    %c0_4 = arith.constant 0 : index
    %4 = vector.load %arg2[%c0_3, %c0_4] : memref<2x768xf32, #tpu.memory_space<vmem>>, vector<2x768xf32>
    tpu.vector_store %arg2[%c0_3, %c0_4], %3 {strides = array<i32>} : memref<2x768xf32, #tpu.memory_space<vmem>>, vector<2x768xf32>,
    return
  }
  func.func @transform_0(%arg0: i32) -> (i32, i32, i32) {
    %c0_i32 = arith.constant 0 : i32
    %c0_i32_0 = arith.constant 0 : i32
    %c0_i32_1 = arith.constant 0 : i32
    return %arg0, %c0_i32, %c0_i32_0 : i32, i32, i32
  }
  func.func @transform_1(%arg0: i32) -> (i32, i32) {
    %c0_i32 = arith.constant 0 : i32
    %c0_i32_0 = arith.constant 0 : i32
    return %arg0, %c0_i32 : i32, i32
  }
}

</mosaic_0001>

<bundles_post_ra>
// kernel: tpu_custom_call.1
= control target key start
LH: loop header
LB: loop body
LE: loop exit
PB: predicated region body
PF: predicated region fallthrough
CT: control target
= control target key end

     0   :  { %6 = vsyncpa [#allocation3], 0  ;;  %vm98_vm0 = vcmask 1040384   ;;  %vm329_vm1 = vcmask 1041409   ;;  %vm331_vm2 = vcmask 1043459   ;;  %vm333_vm3 = vcmask 1045509   ;;  %s700_s0 = inlined_call_operand.vmem [shape: f32[2,49,768], index: 0, kind: input, shape index: {}]   ;;  %s701_s1 = inlined_call_operand.hbm [shape: f32[2,768], index: 1, kind: output, shape index: {}]  }
   0x1   :  { %v9_v0 = vld [vmem:[%s700_s0] sm:$0xff]  ;;  %v10_v1 = vld [vmem:[%s700_s0 + $0x8] sm:$0xff]  ;;  %v11_v2 = vld [vmem:[%s700_s0 + $0x10] sm:$0xff]  ;;  %vm335_vm4 = vcmask 1047559  }
   0x2   :  { %v12_v3 = vld [vmem:[%s700_s0 + $0x18] sm:$0xff]  ;;  %v13_v4 = vld [vmem:[%s700_s0 + $0x20] sm:$0xff]  ;;  %v14_v5 = vld [vmem:[%s700_s0 + $0x28] sm:$0xff] }
   0x3   :  { %v15_v6 = vld [vmem:[%s700_s0 + $0x30] sm:$0xff]  ;;  %v16_v7 = vld [vmem:[%s700_s0 + $0x38] sm:$0xff]  ;;  %v17_v8 = vld [vmem:[%s700_s0 + $0x40] sm:$0xff] }
   0x4   :  { %v18_v9 = vld [vmem:[%s700_s0 + $0x48] sm:$0xff]  ;;  %v19_v10 = vld [vmem:[%s700_s0 + $0x50] sm:$0xff]  ;;  %v93_v11 = vadd.f32 %v15_v6, %v9_v0  ;;  %v107_v12 = vadd.f32 %v16_v7, %v10_v1  ;;  %v20_v13 = vld [vmem:[%s700_s0 + $0x58] sm:$0xff]  ;;  %v120_v16 = vadd.f32 %v17_v8, %v11_v2 }
   0x5   :  { %v21_v14 = vld [vmem:[%s700_s0 + $0x60] sm:$0xff]  ;;  %v22_v15 = vld [vmem:[%s700_s0 + $0x68] sm:$0xff]  ;;  %v133_v17 = vadd.f32 %v18_v9, %v12_v3  ;;  %v146_v18 = vadd.f32 %v19_v10, %v13_v4  ;;  %v23_v19 = vld [vmem:[%s700_s0 + $0x70] sm:$0xff]  ;;  %v159_v24 = vadd.f32 %v20_v13, %v14_v5 }
   0x6   :  { %v24_v20 = vld [vmem:[%s700_s0 + $0x78] sm:$0xff]  ;;  %v25_v21 = vld [vmem:[%s700_s0 + $0x80] sm:$0xff]  ;;  %v94_v22 = vadd.f32 %v93_v11, %v21_v14  ;;  %v108_v23 = vadd.f32 %v107_v12, %v22_v15  ;;  %v26_v25 = vld [vmem:[%s700_s0 + $0x88] sm:$0xff]  ;;  %v121_v28 = vadd.f32 %v120_v16, %v23_v19 }
   0x7   :  { %v27_v26 = vld [vmem:[%s700_s0 + $0x90] sm:$0xff]  ;;  %v28_v27 = vld [vmem:[%s700_s0 + $0x98] sm:$0xff]  ;;  %v134_v29 = vadd.f32 %v133_v17, %v24_v20  ;;  %v147_v30 = vadd.f32 %v146_v18, %v25_v21  ;;  %v29_v31 = vld [vmem:[%s700_s0 + $0xa0] sm:$0xff]  ;;  %v160_v36 = vadd.f32 %v159_v24, %v26_v25 }
   0x8   :  { %v30_v32 = vld [vmem:[%s700_s0 + $0xa8] sm:$0xff]  ;;  %v31_v33 = vld [vmem:[%s700_s0 + $0xb0] sm:$0xff]  ;;  %v95_v34 = vadd.f32 %v94_v22, %v27_v26  ;;  %v109_v35 = vadd.f32 %v108_v23, %v28_v27  ;;  %v32_v37 = vld [vmem:[%s700_s0 + $0xb8] sm:$0xff]  ;;  %v122_v40 = vadd.f32 %v121_v28, %v29_v31 }
   0x9   :  { %v33_v38 = vld [vmem:[%s700_s0 + $0xc0] sm:$0xff]  ;;  %v34_v39 = vld [vmem:[%s700_s0 + $0xc8] sm:$0xff]  ;;  %v135_v41 = vadd.f32 %v134_v29, %v30_v32  ;;  %v148_v42 = vadd.f32 %v147_v30, %v31_v33  ;;  %v35_v43 = vld [vmem:[%s700_s0 + $0xd0] sm:$0xff]  ;;  %v161_v48 = vadd.f32 %v160_v36, %v32_v37 }
   0xa   :  { %v36_v44 = vld [vmem:[%s700_s0 + $0xd8] sm:$0xff]  ;;  %v37_v45 = vld [vmem:[%s700_s0 + $0xe0] sm:$0xff]  ;;  %v96_v46 = vadd.f32 %v95_v34, %v33_v38  ;;  %v110_v47 = vadd.f32 %v109_v35, %v34_v39  ;;  %v38_v49 = vld [vmem:[%s700_s0 + $0xe8] sm:$0xff]  ;;  %v123_v52 = vadd.f32 %v122_v40, %v35_v43 }
   0xb   :  { %v39_v50 = vld [vmem:[%s700_s0 + $0xf0] sm:$0xff]  ;;  %v40_v51 = vld [vmem:[%s700_s0 + $0xf8] sm:$0xff]  ;;  %v136_v53 = vadd.f32 %v135_v41, %v36_v44  ;;  %v149_v54 = vadd.f32 %v148_v42, %v37_v45  ;;  %v41_v55 = vld [vmem:[%s700_s0 + $0x100] sm:$0xff]  ;;  %v162_v60 = vadd.f32 %v161_v48, %v38_v49 }
   0xc   :  { %v42_v56 = vld [vmem:[%s700_s0 + $0x108] sm:$0xff]  ;;  %v43_v57 = vld [vmem:[%s700_s0 + $0x110] sm:$0xff]  ;;  %v97_v58 = vadd.f32 %v96_v46, %v39_v50  ;;  %v111_v59 = vadd.f32 %v110_v47, %v40_v51  ;;  %v44_v61 = vld [vmem:[%s700_s0 + $0x118] sm:$0xff]  ;;  %v124_v0 = vadd.f32 %v123_v52, %v41_v55  ;;  %v279_v51 = vlaneseq }
   0xd   :  { %v45_v62 = vld [vmem:[%s700_s0 + $0x120] sm:$0x1]  ;;  %v46_v63 = vld [vmem:[%s700_s0 + $0x128] sm:$0x1]  ;;  %v137_v1 = vadd.f32 %v136_v53, %v42_v56  ;;  %v47_v2 = vld [vmem:[%s700_s0 + $0x130] sm:$0x1]  ;;  %v150_v5 = vadd.f32 %v149_v54, %v43_v57  ;;  %v163_v6 = vadd.f32 %v162_v60, %v44_v61 }
   0xe   :  { %v48_v3 = vld [vmem:[%s700_s0 + $0x138] sm:$0x1]  ;;  %v49_v4 = vld [vmem:[%s700_s0 + $0x140] sm:$0x1]  ;;  %v50_v7 = vld [vmem:[%s700_s0 + $0x148] sm:$0x1] }
   0xf   :  { %v99_v8 = vsel %vm98_vm0, %v45_v62, 0.0  ;;  %v112_v9 = vsel %vm98_vm0, %v46_v63, 0.0  ;;  %v51_v10 = vld [vmem:[%s700_s0 + $0x150] sm:$0xff]  ;;  %v52_v11 = vld [vmem:[%s700_s0 + $0x158] sm:$0xff]  ;;  %v125_v14 = vsel %vm98_vm0, %v47_v2, 0.0  ;;  %v138_v15 = vsel %vm98_vm0, %v48_v3, 0.0 }
  0x10   :  { %v100_v12 = vadd.f32 %v99_v8, %v97_v58  ;;  %v113_v13 = vadd.f32 %v112_v9, %v111_v59  ;;  %v57_v16 = vld [vmem:[%s700_s0 + $0x180] sm:$0xff]  ;;  %v58_v17 = vld [vmem:[%s700_s0 + $0x188] sm:$0xff]  ;;  %v126_v18 = vadd.f32 %v125_v14, %v124_v0  ;;  %v139_v19 = vadd.f32 %v138_v15, %v137_v1  ;;  %v63_v26 = vld [vmem:[%s700_s0 + $0x1b0] sm:$0xff] }
  0x11   :  { %v151_v20 = vsel %vm98_vm0, %v49_v4, 0.0  ;;  %v164_v21 = vsel %vm98_vm0, %v50_v7, 0.0  ;;  %v64_v27 = vld [vmem:[%s700_s0 + $0x1b8] sm:$0xff]  ;;  %v172_v30 = vadd.f32 %v57_v16, %v51_v10  ;;  %v185_v31 = vadd.f32 %v58_v17, %v52_v11  ;;  %v69_v34 = vld [vmem:[%s700_s0 + $0x1e0] sm:$0xff]  ;;  %v70_v35 = vld [vmem:[%s700_s0 + $0x1e8] sm:$0xff] }
  0x12   :  { %v101_v22 = vrot.slane %v100_v12, 4  ;;  %v114_v23 = vrot.slane %v113_v13, 4  ;;  %v152_v24 = vadd.f32 %v151_v20, %v150_v5  ;;  %v165_v25 = vadd.f32 %v164_v21, %v163_v6  ;;  %v75_v41 = vld [vmem:[%s700_s0 + $0x210] sm:$0xff]  ;;  %v76_v42 = vld [vmem:[%s700_s0 + $0x218] sm:$0xff]  ;;  %v53_v47 = vld [vmem:[%s700_s0 + $0x160] sm:$0xff] }
  0x13   :  { %v127_v28 = vrot.slane %v126_v18, 4  ;;  %v140_v29 = vrot.slane %v139_v19, 4  ;;  %v173_v37 = vadd.f32 %v172_v30, %v63_v26  ;;  %v186_v38 = vadd.f32 %v185_v31, %v64_v27  ;;  %v54_v48 = vld [vmem:[%s700_s0 + $0x168] sm:$0xff]  ;;  %v59_v49 = vld [vmem:[%s700_s0 + $0x190] sm:$0xff]  ;;  %v60_v52 = vld [vmem:[%s700_s0 + $0x198] sm:$0xff] }
  0x14   :  { %v102_v32 = vadd.f32 %v101_v22, %v100_v12  ;;  %v115_v33 = vadd.f32 %v114_v23, %v113_v13  ;;  %v153_v36 = vrot.slane %v152_v24, 4  ;;  %v166_v40 = vrot.slane %v165_v25, 4  ;;  %v81_v53 = vld [vmem:[%s700_s0 + $0x240] sm:$0xff]  ;;  %v82_v54 = vld [vmem:[%s700_s0 + $0x248] sm:$0xff]  ;;  %v55_v60 = vld [vmem:[%s700_s0 + $0x170] sm:$0xff] }
  0x15   :  { %v128_v39 = vadd.f32 %v127_v28, %v126_v18  ;;  %v141_v44 = vadd.f32 %v140_v29, %v139_v19  ;;  %v174_v45 = vadd.f32 %v173_v37, %v69_v34  ;;  %v187_v46 = vadd.f32 %v186_v38, %v70_v35  ;;  %v61_v61 = vld [vmem:[%s700_s0 + $0x1a0] sm:$0xff]  ;;  %v87_v1 = vld [vmem:[%s700_s0 + $0x270] sm:$0x1]  ;;  %v88_v2 = vld [vmem:[%s700_s0 + $0x278] sm:$0x1] }
  0x16   :  { %v103_v43 = vrot.slane %v102_v32, 2  ;;  %v116_v50 = vrot.slane %v115_v33, 2  ;;  %v154_v55 = vadd.f32 %v153_v36, %v152_v24  ;;  %v388_v58 = vmov 1983009808   ;;  %v65_v0 = vld [vmem:[%s700_s0 + $0x1c0] sm:$0xff]  ;;  %v66_v10 = vld [vmem:[%s700_s0 + $0x1c8] sm:$0xff] }
  0x17   :  { %v175_v56 = vadd.f32 %v174_v45, %v75_v41  ;;  %v188_v57 = vadd.f32 %v187_v46, %v76_v42  ;;  %v580_v59 = vunpack.c.l.s4 %v388_v58  ;;  %v129_v62 = vrot.slane %v128_v39, 2  ;;  %v71_v11 = vld [vmem:[%s700_s0 + $0x1f0] sm:$0xff]  ;;  %v56_v16 = vld [vmem:[%s700_s0 + $0x178] sm:$0xff]  ;;  %v62_v17 = vld [vmem:[%s700_s0 + $0x1a8] sm:$0xff] }
  0x18   :  { %v167_v63 = vadd.f32 %v166_v40, %v165_v25  ;;  %v597_v3 = vadd.f32 %v103_v43, %v102_v32  ;;  %v142_v4 = vrot.slane %v141_v44, 2  ;;  %v198_v6 = vadd.f32 %v59_v49, %v53_v47  ;;  %v67_v18 = vld [vmem:[%s700_s0 + $0x1d0] sm:$0xff]  ;;  %v72_v23 = vld [vmem:[%s700_s0 + $0x1f8] sm:$0xff]  ;;  %v77_v24 = vld [vmem:[%s700_s0 + $0x220] sm:$0xff] }
  0x19   :  { %v176_v5 = vadd.f32 %v175_v56, %v81_v53  ;;  %v599_v7 = vadd.f32 %v116_v50, %v115_v33  ;;  %v189_v8 = vadd.f32 %v188_v57, %v82_v54  ;;  %v211_v9 = vadd.f32 %v60_v52, %v54_v48  ;;  %v68_v29 = vld [vmem:[%s700_s0 + $0x1d8] sm:$0xff]  ;;  %v73_v30 = vld [vmem:[%s700_s0 + $0x200] sm:$0xff]  ;;  %v78_v36 = vld [vmem:[%s700_s0 + $0x228] sm:$0xff] }
  0x1a   :  { %v155_v12 = vrot.slane %v154_v55, 2  ;;  %v224_v13 = vadd.f32 %v61_v61, %v55_v60  ;;  %v278_v14 = vunpack.c.0.s8 %v580_v59  ;;  %v608_v15 = vshrl.u32 %v279_v51, 7  ;;  %v89_v31 = vld [vmem:[%s700_s0 + $0x280] sm:$0x1]  ;;  %v83_v37 = vld [vmem:[%s700_s0 + $0x250] sm:$0xff]  ;;  %v74_v42 = vld [vmem:[%s700_s0 + $0x208] sm:$0xff] }
  0x1b   :  { %v168_v19 = vrot.slane %v167_v63, 2  ;;  %v177_v20 = vsel %vm98_vm0, %v87_v1, 0.0  ;;  %v190_v21 = vsel %vm98_vm0, %v88_v2, 0.0  ;;  %v199_v22 = vadd.f32 %v198_v6, %v65_v0  ;;  %v79_v43 = vld [vmem:[%s700_s0 + $0x230] sm:$0xff]  ;;  %v84_v49 = vld [vmem:[%s700_s0 + $0x258] sm:$0xff]  ;;  %v85_v56 = vld [vmem:[%s700_s0 + $0x260] sm:$0xff] }
  0x1c   :  { %v105_v25 = vrot.slane %v597_v3, 1  ;;  %v130_v26 = vadd.f32 %v129_v62, %v128_v39  ;;  %v143_v27 = vadd.f32 %v142_v4, %v141_v44  ;;  %v178_v28 = vadd.f32 %v177_v20, %v176_v5  ;;  %v90_v44 = vld [vmem:[%s700_s0 + $0x288] sm:$0x1]  ;;  %v91_v50 = vld [vmem:[%s700_s0 + $0x290] sm:$0x1] }
  0x1d   :  { %v118_v32 = vrot.slane %v599_v7, 1  ;;  %v191_v33 = vadd.f32 %v190_v21, %v189_v8  ;;  %v200_v34 = vadd.f32 %v199_v22, %v71_v11  ;;  %v212_v35 = vadd.f32 %v211_v9, %v66_v10  ;;  %v92_v62 = vld [vmem:[%s700_s0 + $0x298] sm:$0x1]  ;;  %v86_v4 = vld [vmem:[%s700_s0 + $0x268] sm:$0xff] }
  0x1e   :  { %v644_v38 = vadd.f32 %v155_v12, %v154_v55  ;;  %v179_v39 = vrot.slane %v178_v28, 4  ;;  %v225_v40 = vadd.f32 %v224_v13, %v67_v18  ;;  %v237_v41 = vadd.f32 %v62_v17, %v56_v16  ;;  %v80_v55 = vld [vmem:[%s700_s0 + $0x238] sm:$0xff]  ;;  %s389_s0 = smov [#allocation2]  }
  0x1f   :  { %v655_v45 = vadd.f32 %v168_v19, %v167_v63  ;;  %v192_v46 = vrot.slane %v191_v33, 4  ;;  %v201_v47 = vadd.f32 %v200_v34, %v77_v24  ;;  %v213_v48 = vadd.f32 %v212_v35, %v72_v23  ;;  %s354_s29 = sshll.u32 %s389_s0, 4  ;;  %s355_s29 = int_to_ptr.vmem [resolvable:$true] %s354_s29 }
  0x20   :  { %v180_v51 = vadd.f32 %v179_v39, %v178_v28  ;;  %v203_v52 = vsel %vm98_vm0, %v89_v31, 0.0  ;;  %v226_v53 = vadd.f32 %v225_v40, %v73_v30  ;;  %v238_v54 = vadd.f32 %v237_v41, %v68_v29  ;;  %s364_s30 = scalar_lea.vmem %s355_s29, 192  ;;  %p369_p1 = scmp.lt.s32.totalorder %s355_s29, %s355_s29 }
  0x21   :  { %v131_v57 = vrot.slane %v130_v26, 1  ;;  %v193_v58 = vadd.f32 %v192_v46, %v191_v33  ;;  %v202_v60 = vadd.f32 %v201_v47, %v83_v37  ;;  %v214_v61 = vadd.f32 %v213_v48, %v78_v36  ;;  %p365_p0 = scmp.ne.s32.totalorder %s355_s29, %s364_s30  ;;  %p370_p2 = scmp.lt.s32.totalorder %s364_s30, %s364_s30 }
  0x22   :  { %v181_v63 = vrot.slane %v180_v51, 2  ;;  %v216_v0 = vsel %vm98_vm0, %v90_v44, 0.0  ;;  %v227_v1 = vadd.f32 %v226_v53, %v79_v43  ;;  %v239_v2 = vadd.f32 %v238_v54, %v74_v42 }
  0x23   :  { %v194_v5 = vrot.slane %v193_v58, 2  ;;  %v204_v6 = vadd.f32 %v203_v52, %v202_v60  ;;  %v215_v8 = vadd.f32 %v214_v61, %v84_v49  ;;  %v229_v9 = vsel %vm98_vm0, %v91_v50, 0.0  ;;  %p371_p3 = por %p370_p2, %p369_p1 }
  0x24   :  { %v144_v10 = vrot.slane %v143_v27, 1  ;;  %v182_v11 = vadd.f32 %v181_v63, %v180_v51  ;;  %v228_v12 = vadd.f32 %v227_v1, %v85_v56  ;;  %v240_v13 = vadd.f32 %v239_v2, %v80_v55 }
  0x25   :  { %v195_v16 = vadd.f32 %v194_v5, %v193_v58  ;;  %v205_v17 = vrot.slane %v204_v6, 4  ;;  %v217_v18 = vadd.f32 %v216_v0, %v215_v8  ;;  %v242_v19 = vsel %vm98_vm0, %v92_v62, 0.0  ;;  %p372_p4 = pnand %p371_p3, %p365_p0 }
  0x26   :  { %v106_v20 = vadd.f32 %v105_v25, %v597_v3  ;;  %v183_v21 = vrot.slane %v182_v11, 1  ;;  %v230_v22 = vadd.f32 %v229_v9, %v228_v12  ;;  %v241_v23 = vadd.f32 %v240_v13, %v86_v4 }
  0x27   :  { %v119_v24 = vadd.f32 %v118_v32, %v599_v7  ;;  %v196_v28 = vrot.slane %v195_v16, 1  ;;  %v206_v29 = vadd.f32 %v205_v17, %v204_v6  ;;  %v218_v30 = vrot.slane %v217_v18, 4 }
  0x28   :  { %v132_v31 = vadd.f32 %v131_v57, %v130_v26  ;;  %v145_v33 = vadd.f32 %v144_v10, %v143_v27  ;;  %v231_v34 = vrot.slane %v230_v22, 4  ;;  %v243_v35 = vadd.f32 %v242_v19, %v241_v23 }
  0x29   :  { %v184_v36 = vadd.f32 %v183_v21, %v182_v11  ;;  %v197_v37 = vadd.f32 %v196_v28, %v195_v16  ;;  %v207_v39 = vrot.slane %v206_v29, 2  ;;  %v219_v40 = vadd.f32 %v218_v30, %v217_v18 }
  0x2a   :  { %v157_v41 = vrot.slane %v644_v38, 1  ;;  %v170_v3 = vrot.slane %v655_v45, 1  ;;  %v232_v25 = vadd.f32 %v231_v34, %v230_v22  ;;  %v244_v42 = vrot.slane %v243_v35, 4 }
  0x2b   :  { %v208_v43 = vadd.f32 %v207_v39, %v206_v29  ;;  %v220_v44 = vrot.slane %v219_v40, 2  ;;  %v250_v7 = vmul.f32 0.020408163, %v106_v20  ;;  %v251_v32 = vmul.f32 0.020408163, %v119_v24 }
  0x2c   :  { %v233_v46 = vrot.slane %v232_v25, 2  ;;  %v245_v47 = vadd.f32 %v244_v42, %v243_v35  ;;  %v252_v26 = vmul.f32 0.020408163, %v132_v31  ;;  %v253_v27 = vmul.f32 0.020408163, %v145_v33 }
  0x2d   :  { %v209_v48 = vrot.slane %v208_v43, 1  ;;  %v221_v49 = vadd.f32 %v220_v44, %v219_v40  ;;  %v256_v50 = vmul.f32 0.020408163, %v184_v36  ;;  %v257_v51 = vmul.f32 0.020408163, %v197_v37 }
  0x2e   :  { %v158_v52 = vadd.f32 %v157_v41, %v644_v38  ;;  %v171_v53 = vadd.f32 %v170_v3, %v655_v45  ;;  %v234_v54 = vadd.f32 %v233_v46, %v232_v25  ;;  %v246_v55 = vrot.slane %v245_v47, 2 }
  0x2f   :  { %v210_v56 = vadd.f32 %v209_v48, %v208_v43  ;;  %v222_v57 = vrot.slane %v221_v49, 1  ;;  %v274_v61 = vcombine.low %v250_v7, %v251_v32  ;;  %v281_v62 = vsub.s32 %v278_v14, %v608_v15 }
  0x30   :  { %v235_v58 = vrot.slane %v234_v54, 1  ;;  %v247_v60 = vadd.f32 %v246_v55, %v245_v47  ;;  %v275_v1 = vcombine.low %v252_v26, %v253_v27  ;;  %v299_v2 = vcombine.low %v256_v50, %v257_v51 }
  0x31   :  { %v223_v63 = vadd.f32 %v222_v57, %v221_v49  ;;  %v258_v0 = vmul.f32 0.020408163, %v210_v56  ;;  %v254_v38 = vmul.f32 0.020408163, %v158_v52  ;;  %v255_v6 = vmul.f32 0.020408163, %v171_v53 }
  0x32   :  { %v236_v4 = vadd.f32 %v235_v58, %v234_v54  ;;  %v248_v5 = vrot.slane %v247_v60, 1  ;;  %v282_v10 = vrot.slane %v274_v61, %v281_v62  ;;  %v289_v11 = vrot.slane %v275_v1, %v281_v62 }
  0x33   :  { %v259_v45 = vmul.f32 0.020408163, %v223_v63  ;;  %v307_v13 = vrot.slane %v299_v2, %v281_v62  ;;  %v291_v17 = vcombine.low %v254_v38, %v255_v6 }
  0x34   :  { %v249_v8 = vadd.f32 %v248_v5, %v247_v60  ;;  %v260_v9 = vmul.f32 0.020408163, %v236_v4  ;;  %v290_v14 = vcombine.low %v282_v10, %v289_v11 }
  0x35   :  { %v300_v12 = vcombine.low %v258_v0, %v259_v45  ;;  %v298_v19 = vrot.slane %v291_v17, %v281_v62 }
  0x36   :  { %v261_v16 = vmul.f32 0.020408163, %v249_v8 }
  0x37   :  { %v314_v18 = vrot.slane %v300_v12, %v281_v62 }
  0x38   :  { %v316_v59 = vcombine.low %v260_v9, %v261_v16 }
  0x39   :  { %v315_v15 = vcombine.low %v307_v13, %v314_v18 }
  0x3a   :  { %v323_v20 = vrot.slane %v316_v59, %v281_v62 }
  0x3b   :  { %v328_v21 = vrot.slane %v315_v15, 7 }
  0x3c   :  { %v339_v22 = vrot.slane %v323_v20, 7 }
  0x3d   :  { %v330_v23 = vsel %vm329_vm1, %v328_v21, %v290_v14 }
  0x3e   :  { %v332_v24 = vsel %vm331_vm2, %v328_v21, %v330_v23  ;;  %v340_v28 = vsel %vm329_vm1, %v339_v22, %v298_v19 }
  0x3f   :  { %v334_v29 = vsel %vm333_vm3, %v328_v21, %v332_v24  ;;  %v341_v30 = vsel %vm331_vm2, %v339_v22, %v340_v28 }
  0x40   :  { %v336_v31 = vsel %vm335_vm4, %v328_v21, %v334_v29  ;;  %v342_v33 = vsel %vm333_vm3, %v339_v22, %v341_v30 }
  0x41   :  { %v343_v34 = vsel %vm335_vm4, %v339_v22, %v342_v33  ;;  %346 = vst [vmem:[#allocation2] sm:$0xff] %v336_v31 }
  0x42   :  { %347 = vst [vmem:[#allocation2 + $0x8] sm:$0xf] %v343_v34 }
  0x43   :  { %375 = shalt.err (!%p372_p4)
}
  0x44   :  { %s376_s4 = scalar_lea.hbm %s701_s1, 192 }
  0x45   :  { %p377_p5 = scmp.ne.s32.totalorder %s701_s1, %s376_s4  ;;  %p380_p6 = scmp.lt.u32.totalorder %s376_s4, %s701_s1 }
  0x47   :  { %p382_p7 = pnand %p380_p6, %p377_p5 }
  0x49   :  { %385 = shalt.err (!%p382_p7)
}
  0x4a   :  { %357 = dma.vmem_to_hbm [thread:$0]  %s355_s29, 192, %s701_s1, [#allocation3]  }
  0x4b   :  { %386 = dma.done.wait [#allocation3], 192  }
  0x4c   :  { %387 = vsyncadd [#allocation3], 4294967104 }
  0x4d   :  { %361 = vsyncpa [#allocation3], 1 }

</bundles_post_ra>
